<compile_context>
chip_gen: v7x
topology: tpu7x:2x2x1
jax: 0.10.0
libtpu: 0.0.40
codegen_flags: <defaults>
</compile_context>

<pallas_src>
import jax
import jax.numpy as jnp
from jax.experimental import pallas as pl
from jax.experimental.pallas import tpu as pltpu


def _round_up(x, m):
    return (x + m - 1) // m * m


def _ffn_kernel(x_ref, w1_ref, b1_ref, w2_ref, b2_ref, o_ref, acc_ref):
    # x_ref : (tm, d_pad) row tile of the flattened input
    # w1_ref: (d_pad, tk)  chunk of W1 (columns = hidden chunk)
    # b1_ref: (1, tk)      matching chunk of b1
    # w2_ref: (tk, d_pad)  matching chunk of W2 (rows = hidden chunk)
    # b2_ref: (1, d_pad)
    # o_ref : (tm, d_pad) output tile
    # acc_ref: (tm, d_pad) f32 accumulator (scratch VMEM, persists across k)
    k = pl.program_id(1)

    @pl.when(k == 0)
    def _init():
        # Seed the accumulator with the second bias (broadcast over rows).
        acc_ref[...] = jnp.broadcast_to(
            b2_ref[...].astype(jnp.float32), acc_ref.shape)

    x = x_ref[...]
    # l1 (partial): x @ W1[:, chunk] + b1[chunk], f32 accumulation on the MXU.
    h = jnp.dot(x, w1_ref[...], preferred_element_type=jnp.float32)
    h = h + b1_ref[...].astype(jnp.float32)
    # activation: ReLU (kept in f32 — cheap VPU epilogue).
    h = jnp.maximum(h, 0.0)
    # dropout: identity in eval mode.
    # TODO(synk): training-mode dropout (pltpu.prng_seed + prng_random_bits mask) not implemented.
    # l2 (partial): h[chunk] @ W2[chunk, :] accumulated in f32.
    acc_ref[...] += jnp.dot(h.astype(w2_ref.dtype), w2_ref[...],
                            preferred_element_type=jnp.float32)

    @pl.when(k == pl.num_programs(1) - 1)
    def _finalize():
        o_ref[...] = acc_ref[...].astype(o_ref.dtype)


def ffn_pallas(x, w1_t, b1, w2_t, b2, *, tm=256, tk_hs=512, compute_dtype=None):
    """FFN forward pass.

    x: [..., d_model]; w1_t: (d_model, hs); b1: (hs,); w2_t: (hs, d_model); b2: (d_model,).
    Weights are stored transposed (in_features, out_features) so the kernel does
    plain row-major matmuls on the MXU.
    compute_dtype: optionally cast activations/weights (e.g. jnp.bfloat16 on v6e/v7x);
    accumulation stays f32 and the output is cast back to x.dtype.
    """
    orig_shape = x.shape
    out_dtype = x.dtype
    d_model = orig_shape[-1]
    hs = w1_t.shape[1]
    assert w1_t.shape == (d_model, hs)
    assert w2_t.shape == (hs, d_model)

    if compute_dtype is not None:
        x = x.astype(compute_dtype)
        w1_t = w1_t.astype(compute_dtype)
        b1 = b1.astype(compute_dtype)
        w2_t = w2_t.astype(compute_dtype)
        b2 = b2.astype(compute_dtype)

    x2d = x.reshape(-1, d_model)
    n = x2d.shape[0]

    # ---- tile selection ---------------------------------------------------
    # Rows: big tiles to feed the MXU; clamp for tiny problems, pad ragged rows.
    tm_eff = min(tm, _round_up(n, 8))
    n_pad = _round_up(n, tm_eff)

    # Hidden dim: stream in chunks so weight VMEM is bounded (scales to any hs).
    tk_hs = max(128, _round_up(tk_hs, 128))
    if hs <= tk_hs:
        tk_eff, hs_pad = hs, hs          # single chunk, no padding needed
    else:
        tk_eff = tk_hs
        hs_pad = _round_up(hs, tk_eff)

    # Lane-dense output: pad d_model to a multiple of 128 (unmasked vst).
    d_pad = _round_up(d_model, 128)

    # ---- zero-pad operands (zero padding contributes nothing to the result) ----
    x2d = jnp.pad(x2d, ((0, n_pad - n), (0, d_pad - d_model)))
    w1p = jnp.pad(w1_t, ((0, d_pad - d_model), (0, hs_pad - hs)))
    b1p = jnp.pad(b1.reshape(1, hs), ((0, 0), (0, hs_pad - hs)))
    w2p = jnp.pad(w2_t, ((0, hs_pad - hs), (0, d_pad - d_model)))
    b2p = jnp.pad(b2.reshape(1, d_model), ((0, 0), (0, d_pad - d_model)))

    # ---- VMEM budget + cost estimate ---------------------------------------
    itemsize = jnp.dtype(x2d.dtype).itemsize
    tile_bytes = (
        2 * tm_eff * d_pad * itemsize                 # x tile (double-buffered)
        + 2 * (d_pad * tk_eff + tk_eff) * itemsize    # W1 chunk + b1 chunk
        + 2 * (tk_eff * d_pad + d_pad) * itemsize     # W2 chunk + b2
        + 2 * tm_eff * d_pad * itemsize               # output tile
        + tm_eff * d_pad * 4                          # f32 accumulator scratch
        + tm_eff * tk_eff * 4                         # f32 hidden intermediate
    )
    # Cap at 64 MiB so the same tiling is valid on v7x (64 MiB VMEM per TC).
    vmem_limit = int(min(max(2 * tile_bytes, 32 << 20), 64 << 20))

    cost = pl.CostEstimate(
        flops=4 * n_pad * d_pad * hs_pad,            # two matmuls
        transcendentals=0,
        bytes_accessed=itemsize * (x2d.size + w1p.size + b1p.size
                                   + w2p.size + b2p.size + n_pad * d_pad),
    )

    out = pl.pallas_call(
        _ffn_kernel,
        out_shape=jax.ShapeDtypeStruct((n_pad, d_pad), out_dtype),
        grid_spec=pltpu.PrefetchScalarGridSpec(
            num_scalar_prefetch=0,
            grid=(n_pad // tm_eff, hs_pad // tk_eff),   # (rows parallel, hidden arbitrary/last)
            in_specs=[
                pl.BlockSpec((tm_eff, d_pad), lambda i, k: (i, 0)),   # x row tile
                pl.BlockSpec((d_pad, tk_eff), lambda i, k: (0, k)),   # W1 hidden chunk
                pl.BlockSpec((1, tk_eff), lambda i, k: (0, k)),       # b1 chunk
                pl.BlockSpec((tk_eff, d_pad), lambda i, k: (k, 0)),   # W2 hidden chunk
                pl.BlockSpec((1, d_pad), lambda i, k: (0, 0)),        # b2
            ],
            out_specs=pl.BlockSpec((tm_eff, d_pad), lambda i, k: (i, 0)),
            scratch_shapes=[pltpu.VMEM((tm_eff, d_pad), jnp.float32)],
        ),
        compiler_params=pltpu.CompilerParams(
            dimension_semantics=("parallel", "arbitrary"),
            vmem_limit_bytes=vmem_limit,
        ),
        cost_estimate=cost,
    )(x2d, w1p, b1p, w2p, b2p)

    out = out[:n, :d_model]
    return out.reshape(orig_shape)


def init_ffn_params(key, d_model, hs, dtype=jnp.float32):
    """Deterministic init mimicking PyTorch nn.Linear defaults (uniform +-1/sqrt(fan_in))."""
    k1, k2, k3, k4 = jax.random.split(key, 4)
    bound1 = 1.0 / (d_model ** 0.5)
    bound2 = 1.0 / (hs ** 0.5)
    # stored transposed: (in_features, out_features)
    w1_t = jax.random.uniform(k1, (d_model, hs), dtype, -bound1, bound1)
    b1 = jax.random.uniform(k2, (hs,), dtype, -bound1, bound1)
    w2_t = jax.random.uniform(k3, (hs, d_model), dtype, -bound2, bound2)
    b2 = jax.random.uniform(k4, (d_model,), dtype, -bound2, bound2)
    return w1_t, b1, w2_t, b2


def _ref_ffn(x, w1_t, b1, w2_t, b2):
    d_model = x.shape[-1]
    h = jnp.maximum(x.reshape(-1, d_model) @ w1_t + b1, 0.0)
    return (h @ w2_t + b2).reshape(x.shape)


if __name__ == "__main__":
    key = jax.random.PRNGKey(0)

    # --- small shapes consistent with the module (same as the spec's toy usage) ---
    d_model, hs = 32, 64
    batch, seq = 2, 8
    kx, kp, kx2, kp2 = jax.random.split(key, 4)
    x = jax.random.normal(kx, (batch, seq, d_model), jnp.float32)
    w1_t, b1, w2_t, b2 = init_ffn_params(kp, d_model, hs)

    out = ffn_pallas(x, w1_t, b1, w2_t, b2)
    out = jax.block_until_ready(out)
    ref = _ref_ffn(x, w1_t, b1, w2_t, b2)
    assert out.shape == (batch, seq, d_model)
    assert jnp.allclose(out, ref, atol=1e-5, rtol=1e-5), "mismatch vs reference (small)"

    # --- second check: exercises hidden-dim streaming (hs > tk) + ragged-row padding ---
    d_model2, hs2 = 128, 1024
    batch2, seq2 = 2, 13            # n = 26 -> padded to a multiple of 8
    x2 = jax.random.normal(kx2, (batch2, seq2, d_model2), jnp.float32)
    w1b, b1b, w2b, b2b = init_ffn_params(kp2, d_model2, hs2)

    out2 = ffn_pallas(x2, w1b, b1b, w2b, b2b, tm=256, tk_hs=512)
    out2 = jax.block_until_ready(out2)
    ref2 = _ref_ffn(x2, w1b, b1b, w2b, b2b)
    assert out2.shape == (batch2, seq2, d_model2)
    # Looser tolerance: chunked hidden-dim accumulation + MXU default f32 matmul
    # rounding differ slightly from the single jnp matmul reference.
    assert jnp.allclose(out2, ref2, atol=1e-2, rtol=1e-2), "mismatch vs reference (tiled)"

    print("KERNEL_OK")
</pallas_src>

<mosaic_0001>
module attributes {stable_mosaic.version = 11 : i64} {
  func.func @_ffn_kernel(%arg0: i32, %arg1: i32, %arg2: memref<16x128xf32, #tpu.memory_space<vmem>>, %arg3: memref<128x64xf32, #tpu.memory_space<vmem>>, %arg4: memref<1x64xf32, #tpu.memory_space<vmem>>, %arg5: memref<64x128xf32, #tpu.memory_space<vmem>>, %arg6: memref<1x128xf32, #tpu.memory_space<vmem>>, %arg7: memref<16x128xf32, #tpu.memory_space<vmem>>, %arg8: memref<16x128xf32, #tpu.memory_space<vmem>>) attributes {dimension_semantics = [#tpu.dimension_semantics<parallel>, #tpu.dimension_semantics<arbitrary>], iteration_bounds = array<i64: 1, 1>, scalar_prefetch = 0 : i64, scratch_operands = 1 : i64, tpu.core_type = #tpu.core_type<tc>, window_params = [{transform_indices = @transform_0, window_bounds = array<i64: 16, 128>}, {transform_indices = @transform_1, window_bounds = array<i64: 128, 64>}, {transform_indices = @transform_2, window_bounds = array<i64: 1, 64>}, {transform_indices = @transform_3, window_bounds = array<i64: 64, 128>}, {pipeline_mode = #tpu.pipeline_mode<synchronous>, transform_indices = @transform_4, window_bounds = array<i64: 1, 128>}, {transform_indices = @transform_5, window_bounds = array<i64: 16, 128>}]} {
    %c0_i32 = arith.constant 0 : i32
    %0 = arith.cmpi eq, %arg1, %c0_i32 : i32
    %1 = arith.extui %0 : i1 to i32
    %c0_i32_0 = arith.constant 0 : i32
    %2 = arith.cmpi ne, %1, %c0_i32_0 : i32
    scf.if %2 {
      %c0_16 = arith.constant 0 : index
      %c0_17 = arith.constant 0 : index
      %19 = vector.load %arg6[%c0_16, %c0_17] : memref<1x128xf32, #tpu.memory_space<vmem>>, vector<1x128xf32>
      %20 = vector.shape_cast %19 : vector<1x128xf32> to vector<1x128xf32>
      %21 = vector.broadcast %20 : vector<1x128xf32> to vector<16x128xf32>
      %c0_18 = arith.constant 0 : index
      %c0_19 = arith.constant 0 : index
      %22 = vector.load %arg8[%c0_18, %c0_19] : memref<16x128xf32, #tpu.memory_space<vmem>>, vector<16x128xf32>
      tpu.vector_store %arg8[%c0_18, %c0_19], %21 {strides = array<i32>} : memref<16x128xf32, #tpu.memory_space<vmem>>, vector<16x128xf32>,
    } else {
    }
    %c0 = arith.constant 0 : index
    %c0_1 = arith.constant 0 : index
    %3 = vector.load %arg2[%c0, %c0_1] : memref<16x128xf32, #tpu.memory_space<vmem>>, vector<16x128xf32>
    %c0_2 = arith.constant 0 : index
    %c0_3 = arith.constant 0 : index
    %4 = vector.load %arg3[%c0_2, %c0_3] : memref<128x64xf32, #tpu.memory_space<vmem>>, vector<128x64xf32>
    %cst = arith.constant dense<0.000000e+00> : vector<16x64xf32>
    %5 = tpu.matmul %3, %4, %cst {dimension_numbers = #tpu.dot_dimension_numbers<[1], [0], [0], [1], [0, 0, 1, 1], [], []>} : vector<16x128xf32>, vector<128x64xf32>, vector<16x64xf32> -> vector<16x64xf32>
    %c0_4 = arith.constant 0 : index
    %c0_5 = arith.constant 0 : index
    %6 = vector.load %arg4[%c0_4, %c0_5] : memref<1x64xf32, #tpu.memory_space<vmem>>, vector<1x64xf32>
    %7 = vector.broadcast %6 : vector<1x64xf32> to vector<16x64xf32>
    %8 = arith.addf %5, %7 : vector<16x64xf32>
    %cst_6 = arith.constant 0.000000e+00 : f32
    %9 = vector.broadcast %cst_6 : f32 to vector<16x64xf32>
    %10 = arith.maximumf %8, %9 : vector<16x64xf32>
    %c0_7 = arith.constant 0 : index
    %c0_8 = arith.constant 0 : index
    %11 = vector.load %arg8[%c0_7, %c0_8] : memref<16x128xf32, #tpu.memory_space<vmem>>, vector<16x128xf32>
    %c0_9 = arith.constant 0 : index
    %c0_10 = arith.constant 0 : index
    %12 = vector.load %arg5[%c0_9, %c0_10] : memref<64x128xf32, #tpu.memory_space<vmem>>, vector<64x128xf32>
    %cst_11 = arith.constant dense<0.000000e+00> : vector<16x128xf32>
    %13 = tpu.matmul %10, %12, %cst_11 {dimension_numbers = #tpu.dot_dimension_numbers<[1], [0], [0], [1], [0, 0, 1, 1], [], []>} : vector<16x64xf32>, vector<64x128xf32>, vector<16x128xf32> -> vector<16x128xf32>
    %14 = arith.addf %11, %13 : vector<16x128xf32>
    %c0_12 = arith.constant 0 : index
    %c0_13 = arith.constant 0 : index
    %15 = vector.load %arg8[%c0_12, %c0_13] : memref<16x128xf32, #tpu.memory_space<vmem>>, vector<16x128xf32>
    tpu.vector_store %arg8[%c0_12, %c0_13], %14 {strides = array<i32>} : memref<16x128xf32, #tpu.memory_space<vmem>>, vector<16x128xf32>,
    %c0_i32_14 = arith.constant 0 : i32
    %16 = arith.cmpi eq, %arg1, %c0_i32_14 : i32
    %17 = arith.extui %16 : i1 to i32
    %c0_i32_15 = arith.constant 0 : i32
    %18 = arith.cmpi ne, %17, %c0_i32_15 : i32
    scf.if %18 {
      %c0_16 = arith.constant 0 : index
      %c0_17 = arith.constant 0 : index
      %19 = vector.load %arg8[%c0_16, %c0_17] : memref<16x128xf32, #tpu.memory_space<vmem>>, vector<16x128xf32>
      %c0_18 = arith.constant 0 : index
      %c0_19 = arith.constant 0 : index
      %20 = vector.load %arg7[%c0_18, %c0_19] : memref<16x128xf32, #tpu.memory_space<vmem>>, vector<16x128xf32>
      tpu.vector_store %arg7[%c0_18, %c0_19], %19 {strides = array<i32>} : memref<16x128xf32, #tpu.memory_space<vmem>>, vector<16x128xf32>,
    } else {
    }
    return
  }
  func.func @transform_0(%arg0: i32, %arg1: i32) -> (i32, i32) {
    %c0_i32 = arith.constant 0 : i32
    %c0_i32_0 = arith.constant 0 : i32
    return %arg0, %c0_i32 : i32, i32
  }
  func.func @transform_1(%arg0: i32, %arg1: i32) -> (i32, i32) {
    %c0_i32 = arith.constant 0 : i32
    %c0_i32_0 = arith.constant 0 : i32
    return %c0_i32, %arg1 : i32, i32
  }
  func.func @transform_2(%arg0: i32, %arg1: i32) -> (i32, i32) {
    %c0_i32 = arith.constant 0 : i32
    %c0_i32_0 = arith.constant 0 : i32
    return %c0_i32, %arg1 : i32, i32
  }
  func.func @transform_3(%arg0: i32, %arg1: i32) -> (i32, i32) {
    %c0_i32 = arith.constant 0 : i32
    %c0_i32_0 = arith.constant 0 : i32
    return %arg1, %c0_i32 : i32, i32
  }
  func.func @transform_4(%arg0: i32, %arg1: i32) -> (i32, i32) {
    %c0_i32 = arith.constant 0 : i32
    %c0_i32_0 = arith.constant 0 : i32
    %c0_i32_1 = arith.constant 0 : i32
    return %c0_i32, %c0_i32_0 : i32, i32
  }
  func.func @transform_5(%arg0: i32, %arg1: i32) -> (i32, i32) {
    %c0_i32 = arith.constant 0 : i32
    %c0_i32_0 = arith.constant 0 : i32
    return %arg0, %c0_i32 : i32, i32
  }
}

</mosaic_0001>

<bundles_post_ra>
// kernel: tpu_custom_call.1
= control target key start
LH: loop header
LB: loop body
LE: loop exit
PB: predicated region body
PF: predicated region fallthrough
CT: control target
= control target key end

     0   :  { %s545_s0 = inlined_call_operand.vmem [shape: f32[16,128], index: 0, kind: input, shape index: {}]   ;;  %s546_s1 = inlined_call_operand.vmem [shape: f32[128,64], index: 1, kind: input, shape index: {}]   ;;  %s547_s2 = inlined_call_operand.vmem [shape: f32[1,64], index: 2, kind: input, shape index: {}]   ;;  %s548_s3 = inlined_call_operand.vmem [shape: f32[64,128], index: 3, kind: input, shape index: {}]   ;;  %s549_s4 = inlined_call_operand.vmem [shape: f32[1,128], index: 4, kind: input, shape index: {}]   ;;  %s550_s5 = inlined_call_operand.hbm [shape: f32[16,128], index: 5, kind: output, shape index: {}]  }
   0x1   :  { %v36_v0 = vld [vmem:[%s546_s1] sm:$0xff]  ;;  %v37_v1 = vld [vmem:[%s546_s1 + $0x8] sm:$0xff]  ;;  %v38_v2 = vld [vmem:[%s546_s1 + $0x10] sm:$0xff] }
   0x2   :  { %v341_v3 = vpack.c.bf16 %v37_v1, %v36_v0  ;;  %v39_v4 = vld [vmem:[%s546_s1 + $0x18] sm:$0xff]  ;;  %v40_v6 = vld [vmem:[%s546_s1 + $0x20] sm:$0xff]  ;;  %v41_v7 = vld [vmem:[%s546_s1 + $0x28] sm:$0xff] }
   0x3   :  { %v345_v5 = vpack.c.bf16 %v39_v4, %v38_v2  ;;  %v349_v8 = vpack.c.bf16 %v41_v7, %v40_v6  ;;  %v42_v9 = vld [vmem:[%s546_s1 + $0x30] sm:$0xff]  ;;  %v43_v10 = vld [vmem:[%s546_s1 + $0x38] sm:$0xff]  ;;  %v34_v11 = vld [vmem:[%s545_s0] sm:$0xff] }
   0x4   :  { %342 = vmatprep.subr.bf16.mxu0 %v341_v3  ;;  %319 = vmatprep.mubr.f32.mxu0 %v34_v11  ;;  %v138_v12 = vld [vmem:[%s548_s3] sm:$0xff]  ;;  %v139_v13 = vld [vmem:[%s548_s3 + $0x8] sm:$0xff]  ;;  %v140_v14 = vld [vmem:[%s548_s3 + $0x10] sm:$0xff] }
   0x5   :  { %344 = vmatpush3.bf16.msra.mxu0 %v341_v3  ;;  %v373_v15 = vpack.c.bf16 %v139_v13, %v138_v12  ;;  %v141_v16 = vld [vmem:[%s548_s3 + $0x18] sm:$0xff]  ;;  %v142_v18 = vld [vmem:[%s548_s3 + $0x20] sm:$0xff]  ;;  %v143_v19 = vld [vmem:[%s548_s3 + $0x28] sm:$0xff] }
   0x6   :  { %346 = vmatprep.subr.bf16.mxu0 %v345_v5  ;;  %v377_v17 = vpack.c.bf16 %v141_v16, %v140_v14 }
   0x9   :  { %348 = vmatpush3.bf16.msra.mxu0 %v345_v5 }
   0xa   :  { %10 = vsyncpa [#allocation4], 0  ;;  %350 = vmatprep.subr.bf16.mxu0 %v349_v8  ;;  %v353_v20 = vpack.c.bf16 %v43_v10, %v42_v9  ;;  %374 = vmatprep.subr.bf16.mxu1 %v373_v15  ;;  %v44_v21 = vld [vmem:[%s546_s1 + $0x40] sm:$0xff]  ;;  %v45_v22 = vld [vmem:[%s546_s1 + $0x48] sm:$0xff]  ;;  %v381_v23 = vpack.c.bf16 %v143_v19, %v142_v18  ;;  %vm146_vm0 = vcmask 523264  }
   0xb   :  { %376 = vmatpush3.bf16.msra.mxu1 %v373_v15  ;;  %v357_v24 = vpack.c.bf16 %v45_v22, %v44_v21  ;;  %v46_v25 = vld [vmem:[%s546_s1 + $0x50] sm:$0xff]  ;;  %v47_v26 = vld [vmem:[%s546_s1 + $0x58] sm:$0xff]  ;;  %v48_v28 = vld [vmem:[%s546_s1 + $0x60] sm:$0xff] }
   0xc   :  { %378 = vmatprep.subr.bf16.mxu1 %v377_v17  ;;  %v361_v27 = vpack.c.bf16 %v47_v26, %v46_v25  ;;  %v49_v29 = vld [vmem:[%s546_s1 + $0x68] sm:$0xff]  ;;  %v50_v31 = vld [vmem:[%s546_s1 + $0x70] sm:$0xff]  ;;  %v51_v32 = vld [vmem:[%s546_s1 + $0x78] sm:$0xff] }
   0xd   :  { %352 = vmatpush3.bf16.msra.mxu0 %v349_v8  ;;  %v365_v30 = vpack.c.bf16 %v49_v29, %v48_v28  ;;  %v369_v33 = vpack.c.bf16 %v51_v32, %v50_v31  ;;  %v35_v34 = vld [vmem:[%s545_s0 + $0x8] sm:$0xff]  ;;  %v144_v35 = vld [vmem:[%s548_s3 + $0x30] sm:$0xff]  ;;  %v145_v36 = vld [vmem:[%s548_s3 + $0x38] sm:$0xff]  ;;  %s416_s3 = smov [#allocation3]  }
   0xe   :  { %354 = vmatprep.subr.bf16.mxu0 %v353_v20  ;;  %v385_v37 = vpack.c.bf16 %v145_v36, %v144_v35  ;;  %v256_v38 = vld [vmem:[%s547_s2] ss:$0 sm:$0xff]  ;;  %s244_s22 = sshll.u32 %s416_s3, 4  ;;  %s245_s22 = int_to_ptr.vmem [resolvable:$true] %s244_s22 }
   0xf   :  { %380 = vmatpush3.bf16.msra.mxu1 %v377_v17  ;;  %v255_v45 = vld [vmem:[%s549_s4] ss:$0 sm:$0xff]  ;;  %s392_s2 = scalar_lea.vmem %s245_s22, 256  ;;  %p397_p1 = scmp.lt.s32.totalorder %s245_s22, %s245_s22 }
  0x10   :  { %382 = vmatprep.subr.bf16.mxu1 %v381_v23  ;;  %p393_p0 = scmp.ne.s32.totalorder %s245_s22, %s392_s2  ;;  %p398_p2 = scmp.lt.s32.totalorder %s392_s2, %s392_s2 }
  0x11   :  { %356 = vmatpush3.bf16.msra.mxu0 %v353_v20 }
  0x12   :  { %358 = vmatprep.subr.bf16.mxu0 %v357_v24  ;;  %p399_p3 = por %p398_p2, %p397_p1 }
  0x13   :  { %384 = vmatpush3.bf16.msra.mxu1 %v381_v23 }
  0x14   :  { %386 = vmatprep.subr.bf16.mxu1 %v385_v37  ;;  %p400_p4 = pnand %p399_p3, %p393_p0 }
  0x15   :  { %360 = vmatpush3.bf16.msra.mxu0 %v357_v24 }
  0x16   :  { %362 = vmatprep.subr.bf16.mxu0 %v361_v27 }
  0x17   :  { %388 = vmatpush3.bf16.msra.mxu1 %v385_v37 }
  0x19   :  { %364 = vmatpush3.bf16.msra.mxu0 %v361_v27 }
  0x1a   :  { %366 = vmatprep.subr.bf16.mxu0 %v365_v30 }
  0x1d   :  { %368 = vmatpush3.bf16.msra.mxu0 %v365_v30 }
  0x1e   :  { %370 = vmatprep.subr.bf16.mxu0 %v369_v33 }
  0x21   :  { %372 = vmatpush3.bf16.msra.mxu0 %v369_v33 }
  0x24   :  { %320 = vmatmul.mubr.f32.vlgmr.msra.gmra.mrb[0].mxu0 %v35_v34 }
  0xf7   :  { %v321_v39 = vpop.f32.mrb[0].mxu0 }
  0xf8   :  { %v131_v40 = vadd.f32 %v321_v39, %v256_v38  ;;  %v125_v41 = vpop.f32.mrb[1].mxu0 }
  0xf9   :  { %v126_v42 = vadd.f32 %v256_v38, %v125_v41 }
  0xfa   :  { %v135_v44 = vmax.f32 %v131_v40, 0.0 }
  0xfb   :  { %v134_v43 = vmax.f32 %v126_v42, 0.0 }
  0xfd   :  { %338 = vmatprep.mubr.msk.f32.mxu1 %vm146_vm0, %v134_v43 }
  0xfe   :  { %339 = vmatmul.mubr.msk.f32.vlgmr.msra.gmra.mrb[0].mxu1 %vm146_vm0, %v135_v44 }
 0x1d1   :  { %v340_v46 = vpop.f32.mrb[0].mxu1 }
 0x1d2   :  { %v229_v47 = vadd.f32 %v340_v46, %v255_v45  ;;  %v219_v48 = vpop.f32.mrb[1].mxu1 }
 0x1d3   :  { %v228_v49 = vadd.f32 %v255_v45, %v219_v48 }
 0x1d4   :  { %238 = vst [vmem:[#allocation3 + $0x8] sm:$0xff] %v229_v47 }
 0x1d5   :  { %237 = vst [vmem:[#allocation3] sm:$0xff] %v228_v49 }
 0x1d6   :  { %403 = shalt.err (!%p400_p4)
}
 0x1d7   :  { %s404_s4 = scalar_lea.hbm %s550_s5, 256 }
 0x1d8   :  { %p405_p5 = scmp.ne.s32.totalorder %s550_s5, %s404_s4  ;;  %p408_p6 = scmp.lt.u32.totalorder %s404_s4, %s550_s5 }
 0x1da   :  { %p410_p7 = pnand %p408_p6, %p405_p5 }
 0x1dc   :  { %413 = shalt.err (!%p410_p7)
}
 0x1dd   :  { %s417_s29 = smov 128   ;;  %s418_s30 = smov 8  }
 0x1de   :  { %250 = dma.vmem_to_hbm [thread:$0]  %s245_s22, 256, %s550_s5, [#allocation4], %s417_s29, %s417_s29, %s418_s30  }
 0x1df   :  { %414 = dma.done.wait [#allocation4], 256  }
 0x1e0   :  { %415 = vsyncadd [#allocation4], 4294967040 }
 0x1e1   :  { %254 = vsyncpa [#allocation4], 1 }

</bundles_post_ra>
